<compile_context>
chip_gen: v7x
topology: tpu7x:2x2x1
jax: 0.10.0
libtpu: 0.0.40
codegen_flags: <defaults>
</compile_context>

<pallas_src>
import functools

import jax
import jax.numpy as jnp
from jax import lax
from jax.experimental import pallas as pl
from jax.experimental.pallas import tpu as pltpu


# --------------------------------------------------------------------------- #
# Kernels: one HCNN time step per grid iteration, state carried in VMEM scratch
# --------------------------------------------------------------------------- #
def _seq_tf_kernel(n_obs, state0_ref, obs_ref, wt_ref,
                   exp_ref, next_ref, delta_ref, state_sc):
    """Teacher-forced step.  Shapes: state (B,H), obs (B,H) zero-padded, W.T (H,H)."""
    t = pl.program_id(0)

    @pl.when(t == 0)
    def _():
        state_sc[...] = state0_ref[...]

    s = state_sc[...]                                          # (B, H) f32

    # expectation = ConMat @ s == s[:, :n_obs]; write the full lane-dense slab,
    # wrapper slices the first n_obs lanes.
    exp_ref[...] = s

    # delta = observation - expectation on observed lanes; ConMat.T pads with 0
    # elsewhere, so mask lanes >= n_obs.
    lane = lax.broadcasted_iota(jnp.int32, s.shape, dimension=1)
    delta = jnp.where(lane < n_obs, obs_ref[...] - s, 0.0)     # (B, H)
    delta_ref[...] = delta

    # r_state = s - ConMat.T @ delta ; next_state = W_masked @ tanh(r_state)
    act = jnp.tanh(s - delta).astype(wt_ref.dtype)
    ns = lax.dot_general(act, wt_ref[...], (((1,), (0,)), ((), ())),
                         preferred_element_type=jnp.float32)   # act @ W.T
    state_sc[...] = ns
    next_ref[...] = ns


def _seq_free_kernel(state0_ref, wt_ref, exp_ref, next_ref, state_sc):
    """Free-running step (no observation input, no delta output)."""
    t = pl.program_id(0)

    @pl.when(t == 0)
    def _():
        state_sc[...] = state0_ref[...]

    s = state_sc[...]                                          # (B, H) f32
    exp_ref[...] = s                                           # expectation slab
    act = jnp.tanh(s).astype(wt_ref.dtype)                     # r_state == s (Ide @ s)
    ns = lax.dot_general(act, wt_ref[...], (((1,), (0,)), ((), ())),
                         preferred_element_type=jnp.float32)
    state_sc[...] = ns
    next_ref[...] = ns


# --------------------------------------------------------------------------- #
# Wrappers
# --------------------------------------------------------------------------- #
def large_sparse_hcnn_sequence(state0, w_masked, *, n_obs, teacher_forcing,
                               observations=None, num_steps=None,
                               weight_dtype=jnp.float32):
    """Run T HCNN-cell steps inside a single Pallas kernel.

    state0:        (H,) or (B, H) f32 initial state.
    w_masked:      (H, H) masked sparse weight (nn.Linear convention, out x in).
    observations:  (T, n_obs) or (T, B, n_obs) when teacher_forcing=True.
    num_steps:     T when teacher_forcing=False.
    Returns (expectations, states[, deltas]) with leading time axis T.
    """
    state0 = jnp.asarray(state0, jnp.float32)
    squeeze_batch = state0.ndim == 1
    if squeeze_batch:
        state0 = state0[None, :]
    B, H = state0.shape
    if n_obs > H:
        raise ValueError("n_obs must be <= n_hid_vars")

    # Pre-transpose the constant masked weight ONCE so the kernel contracts
    # (1,0) -> no per-step transpose on the MXU feed path.
    wt = jnp.asarray(w_masked, jnp.float32).T.astype(weight_dtype)

    w_spec = pl.BlockSpec((H, H), lambda t: (0, 0))          # resident in VMEM
    s0_spec = pl.BlockSpec((B, H), lambda t: (0, 0))         # resident in VMEM
    step_spec = pl.BlockSpec((None, B, H), lambda t: (t, 0, 0))
    compiler_params = pltpu.CompilerParams(dimension_semantics=("arbitrary",))

    if teacher_forcing:
        if observations is None:
            raise ValueError("`observations` must be provided when teacher_forcing=True.")
        observations = jnp.asarray(observations, jnp.float32)
        if observations.ndim == 2:                           # (T, n_obs) -> (T, 1, n_obs)
            observations = observations[:, None, :]
        T = observations.shape[0]
        # Zero-pad observations to the full H lanes -> lane-dense step blocks.
        obs_p = jnp.zeros((T, B, H), jnp.float32).at[:, :, :n_obs].set(observations)

        kernel = functools.partial(_seq_tf_kernel, n_obs)
        exp_s, next_s, delta_s = pl.pallas_call(
            kernel,
            out_shape=(jax.ShapeDtypeStruct((T, B, H), jnp.float32),
                       jax.ShapeDtypeStruct((T, B, H), jnp.float32),
                       jax.ShapeDtypeStruct((T, B, H), jnp.float32)),
            grid_spec=pltpu.PrefetchScalarGridSpec(
                num_scalar_prefetch=0,
                grid=(T,),
                in_specs=[s0_spec, step_spec, w_spec],
                out_specs=[step_spec, step_spec, step_spec],
                scratch_shapes=[pltpu.VMEM((B, H), jnp.float32)]),
            compiler_params=compiler_params,
        )(state0, obs_p, wt)

        expectations = exp_s[:, :, :n_obs]
        deltas = delta_s[:, :, :n_obs]
        states = next_s
        if squeeze_batch:
            expectations, states, deltas = expectations[:, 0], states[:, 0], deltas[:, 0]
        return expectations, states, deltas

    # ---- free-running: no observation input, no delta output ----
    if num_steps is None:
        raise ValueError("`num_steps` must be provided when teacher_forcing=False.")
    T = int(num_steps)
    exp_s, next_s = pl.pallas_call(
        _seq_free_kernel,
        out_shape=(jax.ShapeDtypeStruct((T, B, H), jnp.float32),
                   jax.ShapeDtypeStruct((T, B, H), jnp.float32)),
        grid_spec=pltpu.PrefetchScalarGridSpec(
            num_scalar_prefetch=0,
            grid=(T,),
            in_specs=[s0_spec, w_spec],
            out_specs=[step_spec, step_spec],
            scratch_shapes=[pltpu.VMEM((B, H), jnp.float32)]),
        compiler_params=compiler_params,
    )(state0, wt)

    expectations = exp_s[:, :, :n_obs]
    states = next_s
    if squeeze_batch:
        expectations, states = expectations[:, 0], states[:, 0]
    return expectations, states


def large_sparse_cell(state, teacher_forcing, observation, w_masked, n_obs):
    """Single-step API matching LargeSparse_cell.forward (state: (H,), obs: (n_obs,))."""
    if teacher_forcing:
        if observation is None:
            raise ValueError("`observation` must be provided when `teacher_forcing` is True.")
        obs = jnp.asarray(observation, jnp.float32).reshape(1, -1)
        exps, states, deltas = large_sparse_hcnn_sequence(
            state, w_masked, n_obs=n_obs, teacher_forcing=True, observations=obs)
        return exps[0], states[0], deltas[0]
    exps, states = large_sparse_hcnn_sequence(
        state, w_masked, n_obs=n_obs, teacher_forcing=False, num_steps=1)
    return exps[0], states[0], None


# --------------------------------------------------------------------------- #
# Pure-JAX reference (mirrors the PyTorch module exactly)
# --------------------------------------------------------------------------- #
def _reference_cell(state, teacher_forcing, observation, conmat, w_masked):
    expectation = conmat @ state
    if teacher_forcing:
        delta = observation - expectation
        teach_forc = conmat.T @ delta
        r_state = state - teach_forc
        next_state = w_masked @ jnp.tanh(r_state)
        return expectation, next_state, delta
    ide = jnp.eye(state.shape[0], dtype=jnp.float32)
    r_state = ide @ state
    next_state = w_masked @ jnp.tanh(r_state)
    return expectation, next_state, None


if __name__ == "__main__":
    n_obs = 16
    n_hid_vars = 128
    T = 8
    init_lo, init_hi = -0.75, 0.75
    sparsity = 0.3

    key = jax.random.PRNGKey(0)
    k_w, k_mask, k_state, k_obs = jax.random.split(key, 4)

    # CustomSparseLinear: uniform(-0.75, 0.75) weight with random sparsity mask.
    w = jax.random.uniform(k_w, (n_hid_vars, n_hid_vars),
                           minval=init_lo, maxval=init_hi, dtype=jnp.float32)
    total = n_hid_vars * n_hid_vars
    zeroed = int(sparsity * total)
    perm = jax.random.permutation(k_mask, total)
    flat_mask = jnp.ones((total,), jnp.float32).at[perm[:zeroed]].set(0.0)
    w_masked = w * flat_mask.reshape(n_hid_vars, n_hid_vars)

    conmat = jnp.eye(n_obs, n_hid_vars, dtype=jnp.float32)   # reference only

    state = jax.random.normal(k_state, (n_hid_vars,), dtype=jnp.float32)
    observations = jax.random.normal(k_obs, (T, n_obs), dtype=jnp.float32)

    # ---- single step, teacher_forcing = True ----
    exp_tf, next_tf, delta_tf = large_sparse_cell(
        state, True, observations[0], w_masked, n_obs)
    jax.block_until_ready((exp_tf, next_tf, delta_tf))
    r_exp, r_next, r_delta = _reference_cell(state, True, observations[0], conmat, w_masked)
    assert jnp.allclose(exp_tf, r_exp, atol=2e-5)
    assert jnp.allclose(next_tf, r_next, atol=2e-5)
    assert jnp.allclose(delta_tf, r_delta, atol=2e-5)

    # ---- single step, teacher_forcing = False ----
    exp_nf, next_nf, delta_nf = large_sparse_cell(state, False, None, w_masked, n_obs)
    jax.block_until_ready((exp_nf, next_nf))
    r_exp2, r_next2, _ = _reference_cell(state, False, None, conmat, w_masked)
    assert delta_nf is None
    assert jnp.allclose(exp_nf, r_exp2, atol=2e-5)
    assert jnp.allclose(next_nf, r_next2, atol=2e-5)

    # ---- full sequence (recurrence inside one kernel), teacher forcing ----
    exps_seq, states_seq, deltas_seq = large_sparse_hcnn_sequence(
        state, w_masked, n_obs=n_obs, teacher_forcing=True, observations=observations)
    jax.block_until_ready((exps_seq, states_seq, deltas_seq))
    s = state
    for t in range(T):
        e_r, s_next, d_r = _reference_cell(s, True, observations[t], conmat, w_masked)
        assert jnp.allclose(exps_seq[t], e_r, atol=1e-4)
        assert jnp.allclose(deltas_seq[t], d_r, atol=1e-4)
        assert jnp.allclose(states_seq[t], s_next, atol=1e-4)
        s = s_next

    # ---- full sequence, free running ----
    exps_fr, states_fr = large_sparse_hcnn_sequence(
        state, w_masked, n_obs=n_obs, teacher_forcing=False, num_steps=T)
    jax.block_until_ready((exps_fr, states_fr))
    s = state
    for t in range(T):
        e_r, s_next, _ = _reference_cell(s, False, None, conmat, w_masked)
        assert jnp.allclose(exps_fr[t], e_r, atol=1e-4)
        assert jnp.allclose(states_fr[t], s_next, atol=1e-4)
        s = s_next

    print("KERNEL_OK")
</pallas_src>

<mosaic_0001>
module attributes {stable_mosaic.version = 11 : i64} {
  func.func @_seq_tf_kernel(%arg0: i32, %arg1: memref<1x128xf32, #tpu.memory_space<vmem>>, %arg2: memref<1x1x128xf32, #tpu.memory_space<vmem>>, %arg3: memref<128x128xf32, #tpu.memory_space<vmem>>, %arg4: memref<1x1x128xf32, #tpu.memory_space<vmem>>, %arg5: memref<1x1x128xf32, #tpu.memory_space<vmem>>, %arg6: memref<1x1x128xf32, #tpu.memory_space<vmem>>, %arg7: memref<1x128xf32, #tpu.memory_space<vmem>>) attributes {dimension_semantics = [#tpu.dimension_semantics<arbitrary>], iteration_bounds = array<i64: 1>, scalar_prefetch = 0 : i64, scratch_operands = 1 : i64, tpu.core_type = #tpu.core_type<tc>, window_params = [{pipeline_mode = #tpu.pipeline_mode<synchronous>, transform_indices = @transform_0, window_bounds = array<i64: 1, 128>}, {transform_indices = @transform_1, window_bounds = array<i64: 1, 1, 128>}, {pipeline_mode = #tpu.pipeline_mode<synchronous>, transform_indices = @transform_2, window_bounds = array<i64: 128, 128>}, {transform_indices = @transform_3, window_bounds = array<i64: 1, 1, 128>}, {transform_indices = @transform_4, window_bounds = array<i64: 1, 1, 128>}, {transform_indices = @transform_5, window_bounds = array<i64: 1, 1, 128>}]} {
    %c0_i32 = arith.constant 0 : i32
    %0 = arith.cmpi eq, %arg0, %c0_i32 : i32
    %1 = arith.extui %0 : i1 to i32
    %c0_i32_0 = arith.constant 0 : i32
    %2 = arith.cmpi ne, %1, %c0_i32_0 : i32
    scf.if %2 {
      %c0_19 = arith.constant 0 : index
      %c0_20 = arith.constant 0 : index
      %26 = vector.load %arg1[%c0_19, %c0_20] : memref<1x128xf32, #tpu.memory_space<vmem>>, vector<1x128xf32>
      %c0_21 = arith.constant 0 : index
      %c0_22 = arith.constant 0 : index
      %27 = vector.load %arg7[%c0_21, %c0_22] : memref<1x128xf32, #tpu.memory_space<vmem>>, vector<1x128xf32>
      tpu.vector_store %arg7[%c0_21, %c0_22], %26 {strides = array<i32>} : memref<1x128xf32, #tpu.memory_space<vmem>>, vector<1x128xf32>,
    } else {
    }
    %c0 = arith.constant 0 : index
    %c0_1 = arith.constant 0 : index
    %3 = vector.load %arg7[%c0, %c0_1] : memref<1x128xf32, #tpu.memory_space<vmem>>, vector<1x128xf32>
    %c0_2 = arith.constant 0 : index
    %c0_3 = arith.constant 0 : index
    %c0_4 = arith.constant 0 : index
    %4 = vector.load %arg4[%c0_2, %c0_3, %c0_4] : memref<1x1x128xf32, #tpu.memory_space<vmem>>, vector<1x1x128xf32>
    %5 = vector.shape_cast %4 : vector<1x1x128xf32> to vector<1x128xf32>
    %6 = vector.shape_cast %3 : vector<1x128xf32> to vector<1x1x128xf32>
    tpu.vector_store %arg4[%c0_2, %c0_3, %c0_4], %6 {strides = array<i32>} : memref<1x1x128xf32, #tpu.memory_space<vmem>>, vector<1x1x128xf32>,
    %7 = tpu.iota {dimensions = array<i32: 1>} : vector<1x128xi32>
    %c16_i32 = arith.constant 16 : i32
    %8 = vector.broadcast %c16_i32 : i32 to vector<1x128xi32>
    %9 = arith.cmpi slt, %7, %8 : vector<1x128xi32>
    %c0_5 = arith.constant 0 : index
    %c0_6 = arith.constant 0 : index
    %c0_7 = arith.constant 0 : index
    %10 = vector.load %arg2[%c0_5, %c0_6, %c0_7] : memref<1x1x128xf32, #tpu.memory_space<vmem>>, vector<1x1x128xf32>
    %11 = vector.shape_cast %10 : vector<1x1x128xf32> to vector<1x128xf32>
    %12 = arith.subf %11, %3 : vector<1x128xf32>
    %cst = arith.constant 0.000000e+00 : f32
    %13 = vector.broadcast %cst : f32 to vector<1x128xf32>
    %14 = arith.select %9, %12, %13 : vector<1x128xi1>, vector<1x128xf32>
    %c0_8 = arith.constant 0 : index
    %c0_9 = arith.constant 0 : index
    %c0_10 = arith.constant 0 : index
    %15 = vector.load %arg6[%c0_8, %c0_9, %c0_10] : memref<1x1x128xf32, #tpu.memory_space<vmem>>, vector<1x1x128xf32>
    %16 = vector.shape_cast %15 : vector<1x1x128xf32> to vector<1x128xf32>
    %17 = vector.shape_cast %14 : vector<1x128xf32> to vector<1x1x128xf32>
    tpu.vector_store %arg6[%c0_8, %c0_9, %c0_10], %17 {strides = array<i32>} : memref<1x1x128xf32, #tpu.memory_space<vmem>>, vector<1x1x128xf32>,
    %18 = arith.subf %3, %14 : vector<1x128xf32>
    %19 = math.tanh %18 : vector<1x128xf32>
    %c0_11 = arith.constant 0 : index
    %c0_12 = arith.constant 0 : index
    %20 = vector.load %arg3[%c0_11, %c0_12] : memref<128x128xf32, #tpu.memory_space<vmem>>, vector<128x128xf32>
    %cst_13 = arith.constant dense<0.000000e+00> : vector<1x128xf32>
    %21 = tpu.matmul %19, %20, %cst_13 {dimension_numbers = #tpu.dot_dimension_numbers<[1], [0], [0], [1], [0, 0, 1, 1], [], []>} : vector<1x128xf32>, vector<128x128xf32>, vector<1x128xf32> -> vector<1x128xf32>
    %c0_14 = arith.constant 0 : index
    %c0_15 = arith.constant 0 : index
    %22 = vector.load %arg7[%c0_14, %c0_15] : memref<1x128xf32, #tpu.memory_space<vmem>>, vector<1x128xf32>
    tpu.vector_store %arg7[%c0_14, %c0_15], %21 {strides = array<i32>} : memref<1x128xf32, #tpu.memory_space<vmem>>, vector<1x128xf32>,
    %c0_16 = arith.constant 0 : index
    %c0_17 = arith.constant 0 : index
    %c0_18 = arith.constant 0 : index
    %23 = vector.load %arg5[%c0_16, %c0_17, %c0_18] : memref<1x1x128xf32, #tpu.memory_space<vmem>>, vector<1x1x128xf32>
    %24 = vector.shape_cast %23 : vector<1x1x128xf32> to vector<1x128xf32>
    %25 = vector.shape_cast %21 : vector<1x128xf32> to vector<1x1x128xf32>
    tpu.vector_store %arg5[%c0_16, %c0_17, %c0_18], %25 {strides = array<i32>} : memref<1x1x128xf32, #tpu.memory_space<vmem>>, vector<1x1x128xf32>,
    return
  }
  func.func @transform_0(%arg0: i32) -> (i32, i32) {
    %c0_i32 = arith.constant 0 : i32
    %c0_i32_0 = arith.constant 0 : i32
    %c0_i32_1 = arith.constant 0 : i32
    return %c0_i32, %c0_i32_0 : i32, i32
  }
  func.func @transform_1(%arg0: i32) -> (i32, i32, i32) {
    %c0_i32 = arith.constant 0 : i32
    %c0_i32_0 = arith.constant 0 : i32
    %c0_i32_1 = arith.constant 0 : i32
    return %arg0, %c0_i32, %c0_i32_0 : i32, i32, i32
  }
  func.func @transform_2(%arg0: i32) -> (i32, i32) {
    %c0_i32 = arith.constant 0 : i32
    %c0_i32_0 = arith.constant 0 : i32
    %c0_i32_1 = arith.constant 0 : i32
    return %c0_i32, %c0_i32_0 : i32, i32
  }
  func.func @transform_3(%arg0: i32) -> (i32, i32, i32) {
    %c0_i32 = arith.constant 0 : i32
    %c0_i32_0 = arith.constant 0 : i32
    %c0_i32_1 = arith.constant 0 : i32
    return %arg0, %c0_i32, %c0_i32_0 : i32, i32, i32
  }
  func.func @transform_4(%arg0: i32) -> (i32, i32, i32) {
    %c0_i32 = arith.constant 0 : i32
    %c0_i32_0 = arith.constant 0 : i32
    %c0_i32_1 = arith.constant 0 : i32
    return %arg0, %c0_i32, %c0_i32_0 : i32, i32, i32
  }
  func.func @transform_5(%arg0: i32) -> (i32, i32, i32) {
    %c0_i32 = arith.constant 0 : i32
    %c0_i32_0 = arith.constant 0 : i32
    %c0_i32_1 = arith.constant 0 : i32
    return %arg0, %c0_i32, %c0_i32_0 : i32, i32, i32
  }
}

</mosaic_0001>

<bundles_post_ra>
// kernel: tpu_custom_call.1
= control target key start
LH: loop header
LB: loop body
LE: loop exit
PB: predicated region body
PF: predicated region fallthrough
CT: control target
= control target key end

     0   :  { %11 = vsyncpa [#allocation4], 0  ;;  %s517_s0 = inlined_call_operand.hbm [shape: f32[1,128], index: 0, kind: input, shape index: {}]   ;;  %s518_s1 = inlined_call_operand.vmem [shape: f32[1,1,128], index: 1, kind: input, shape index: {}]   ;;  %s519_s2 = inlined_call_operand.hbm [shape: f32[128,128], index: 2, kind: input, shape index: {}]   ;;  %s520_s3 = inlined_call_operand.hbm [shape: f32[1,1,128], index: 3, kind: output, shape index: {0}]   ;;  %s521_s4 = inlined_call_operand.hbm [shape: f32[1,1,128], index: 4, kind: output, shape index: {1}]   ;;  %s522_s5 = inlined_call_operand.hbm [shape: f32[1,1,128], index: 5, kind: output, shape index: {2}]  }
   0x1   :  { %12 = vsyncpa [#allocation7], 0 }
   0x2   :  { %13 = vsyncpa [#allocation5], 0 }
   0x3   :  { %14 = vsyncpa [#allocation10], 0  ;;  %s399_s18 = smov [#allocation3]   ;;  %s400_s20 = smov [#allocation6]  }
   0x4   :  { %s21_s19 = sshll.u32 %s399_s18, 4  ;;  %s32_s21 = sshll.u32 %s400_s20, 4  ;;  %s22_s19 = int_to_ptr.vmem [resolvable:$true] %s21_s19  ;;  %s439_s21 = int_to_ptr.vmem [resolvable:$true] %s32_s21 }
   0x5   :  { %s281_s24 = scalar_lea.hbm %s517_s0, 16 }
   0x6   :  { %p282_p0 = scmp.ne.s32.totalorder %s517_s0, %s281_s24  ;;  %p285_p1 = scmp.lt.u32.totalorder %s281_s24, %s517_s0 }
   0x8   :  { %p287_p2 = pnand %p285_p1, %p282_p0 }
   0xa   :  { %290 = shalt.err (!%p287_p2)
}
   0xb   :  { %s291_s29 = scalar_lea.vmem %s22_s19, 16  ;;  %s295_s30 = scalar_lea.vmem %s22_s19, 32 }
   0xc   :  { %p292_p3 = scmp.ne.s32.totalorder %s22_s19, %s291_s29  ;;  %p296_p4 = scmp.lt.s32.totalorder %s22_s19, %s22_s19 }
   0xd   :  { %p297_p5 = scmp.lt.s32.totalorder %s295_s30, %s291_s29 }
   0xf   :  { %p298_p6 = por %p297_p5, %p296_p4 }
  0x11   :  { %p299_p7 = pnand %p298_p6, %p292_p3 }
  0x13   :  { %302 = shalt.err (!%p299_p7)
}
  0x14   :  { %24 = dma.hbm_to_vmem [thread:$0]  %s517_s0, 16, %s22_s19, [#allocation4]  }
  0x15   :  { %s303_s10 = scalar_lea.hbm %s519_s2, 2048 }
  0x16   :  { %p304_p8 = scmp.ne.s32.totalorder %s519_s2, %s303_s10  ;;  %p307_p9 = scmp.lt.u32.totalorder %s303_s10, %s519_s2 }
  0x18   :  { %p309_p10 = pnand %p307_p9, %p304_p8 }
  0x1a   :  { %312 = shalt.err (!%p309_p10)
}
  0x1b   :  { %s313_s15 = scalar_lea.vmem %s439_s21, 2048  ;;  %p318_p12 = scmp.lt.s32.totalorder %s439_s21, %s439_s21 }
  0x1c   :  { %p314_p11 = scmp.ne.s32.totalorder %s439_s21, %s313_s15  ;;  %p319_p13 = scmp.lt.s32.totalorder %s313_s15, %s313_s15 }
  0x1e   :  { %p320_p0 = por %p319_p13, %p318_p12 }
  0x20   :  { %p321_p1 = pnand %p320_p0, %p314_p11 }
  0x22   :  { %324 = shalt.err (!%p321_p1)
}
  0x23   :  { %s401_s0 = smov 128   ;;  %s402_s16 = smov 8  }
  0x24   :  { %38 = dma.hbm_to_vmem [thread:$0]  %s519_s2, 2048, %s439_s21, [#allocation7], %s401_s0, %s401_s0, %s402_s16  }
  0x25   :  { %391 = dma.done.wait [#allocation4], 16  }
  0x26   :  { %392 = vsyncadd [#allocation4], 4294967280 }
  0x27   :  { %393 = dma.done.wait [#allocation7], 2048  }
  0x28   :  { %394 = vsyncadd [#allocation7], 4294965248  ;;  %v403_v0 = vmov 0.0|0.0   ;;  %vm404_vm0 = vmmov 0   ;;  %v405_v1 = vmov 0.0   ;;  %v62_v2 = vld [vmem:[#allocation6] sm:$0xff]  ;;  %v53_v11 = vlaneseq }
  0x29   :  { %245 = vmatprep.subr.bf16.mxu0 %v403_v0  ;;  %242 = vmatprep.mubr.msk.f32.mxu0 %vm404_vm0, %v405_v1  ;;  %v63_v3 = vld [vmem:[#allocation6 + $0x8] sm:$0xff]  ;;  %v64_v4 = vld [vmem:[#allocation6 + $0x10] sm:$0xff]  ;;  %v65_v6 = vld [vmem:[#allocation6 + $0x18] sm:$0xff] }
  0x2a   :  { %v246_v5 = vpack.c.bf16 %v63_v3, %v62_v2  ;;  %v249_v7 = vpack.c.bf16 %v65_v6, %v64_v4  ;;  %v66_v8 = vld [vmem:[#allocation6 + $0x20] sm:$0xff]  ;;  %v67_v9 = vld [vmem:[#allocation6 + $0x28] sm:$0xff]  ;;  %v49_v10 = vld [vmem:[#allocation3] sm:$0x1]  ;;  %v54_v15 = vand.u32 127, %v53_v11 }
  0x2b   :  { %50 = vst [vmem:[#allocation2] sm:$0x1] %v49_v10  ;;  %v252_v12 = vpack.c.bf16 %v67_v9, %v66_v8  ;;  %v68_v13 = vld [vmem:[#allocation6 + $0x30] sm:$0xff]  ;;  %v69_v14 = vld [vmem:[#allocation6 + $0x38] sm:$0xff]  ;;  %v70_v18 = vld [vmem:[#allocation6 + $0x40] sm:$0xff] }
  0x2c   :  { %247 = vmatpush3.bf16.msra.mxu0 %v246_v5  ;;  %v255_v16 = vpack.c.bf16 %v69_v14, %v68_v13  ;;  %v56_v17 = vld [vmem:[%s518_s1] sm:$0x1]  ;;  %v71_v19 = vld [vmem:[#allocation6 + $0x48] sm:$0xff]  ;;  %vm55_vm1 = vcmp.lt.s32.totalorder %v54_v15, 16  ;;  %v72_v23 = vld [vmem:[#allocation6 + $0x50] sm:$0xff]  ;;  %s406_s1 = smov [#allocation8]  }
  0x2d   :  { %248 = vmatprep.subr.bf16.mxu0 %v403_v0  ;;  %v258_v22 = vpack.c.bf16 %v71_v19, %v70_v18  ;;  %v73_v24 = vld [vmem:[#allocation6 + $0x58] sm:$0xff]  ;;  %v74_v28 = vld [vmem:[#allocation6 + $0x60] sm:$0xff]  ;;  %v75_v29 = vld [vmem:[#allocation6 + $0x68] sm:$0xff]  ;;  %s156_s20 = sshll.u32 %s406_s1, 4  ;;  %s157_s20 = int_to_ptr.vmem [resolvable:$true] %s156_s20 }
  0x2e   :  { %v261_v27 = vpack.c.bf16 %v73_v24, %v72_v23  ;;  %v264_v30 = vpack.c.bf16 %v75_v29, %v74_v28  ;;  %v76_v31 = vld [vmem:[#allocation6 + $0x70] sm:$0xff]  ;;  %v77_v32 = vld [vmem:[#allocation6 + $0x78] sm:$0xff]  ;;  %s325_s21 = scalar_lea.vmem %s157_s20, 16  ;;  %s329_s22 = scalar_lea.vmem %s157_s20, 32 }
  0x2f   :  { %v267_v33 = vpack.c.bf16 %v77_v32, %v76_v31  ;;  %p326_p2 = scmp.ne.s32.totalorder %s157_s20, %s325_s21  ;;  %p330_p3 = scmp.lt.s32.totalorder %s157_s20, %s157_s20 }
  0x30   :  { %250 = vmatpush3.bf16.msra.mxu0 %v249_v7  ;;  %p331_p4 = scmp.lt.s32.totalorder %s329_s22, %s325_s21 }
  0x31   :  { %251 = vmatprep.subr.bf16.mxu0 %v403_v0 }
  0x32   :  { %v51_v20 = vld [vmem:[#allocation2] sm:$0x1]  ;;  %p332_p5 = por %p331_p4, %p330_p3 }
  0x33   :  { %v57_v21 = vsub.f32 %v56_v17, %v51_v20  ;;  %52 = vst [vmem:[#allocation8] sm:$0x1] %v51_v20 }
  0x34   :  { %253 = vmatpush3.bf16.msra.mxu0 %v252_v12  ;;  %p333_p6 = pnand %p332_p5, %p326_p2 }
  0x35   :  { %254 = vmatprep.subr.bf16.mxu0 %v403_v0  ;;  %v58_v25 = vsel %vm55_vm1, %v57_v21, 0.0 }
  0x36   :  { %v60_v26 = vsub.f32 %v51_v20, %v58_v25  ;;  %59 = vst [vmem:[#allocation11] sm:$0x1] %v58_v25 }
  0x38   :  { %256 = vmatpush3.bf16.msra.mxu0 %v255_v16  ;;  %279 = vtanh.f32 %v60_v26 }
  0x39   :  { %257 = vmatprep.subr.bf16.mxu0 %v403_v0 }
  0x3c   :  { %259 = vmatpush3.bf16.msra.mxu0 %v258_v22 }
  0x3d   :  { %260 = vmatprep.subr.bf16.mxu0 %v403_v0 }
  0x40   :  { %262 = vmatpush3.bf16.msra.mxu0 %v261_v27 }
  0x41   :  { %263 = vmatprep.subr.bf16.mxu0 %v403_v0 }
  0x42   :  { %v280_v34 = vpop.eup %279 }
  0x44   :  { %265 = vmatpush3.bf16.msra.mxu0 %v264_v30 }
  0x45   :  { %266 = vmatprep.subr.bf16.mxu0 %v403_v0 }
  0x48   :  { %268 = vmatpush3.bf16.msra.mxu0 %v267_v33 }
  0x4b   :  { %243 = vmatmul.mubr.f32.vlgmr.msra.gmra.mrb[0].mxu0 %v280_v34 }
  0x4c   :  { %336 = shalt.err (!%p333_p6)
}
  0x4d   :  { %s337_s25 = scalar_lea.hbm %s520_s3, 16 }
  0x4e   :  { %p338_p7 = scmp.ne.s32.totalorder %s520_s3, %s337_s25  ;;  %p341_p8 = scmp.lt.u32.totalorder %s337_s25, %s520_s3 }
  0x50   :  { %p343_p9 = pnand %p341_p8, %p338_p7 }
  0x52   :  { %346 = shalt.err (!%p343_p9)
}
  0x53   :  { %159 = dma.vmem_to_hbm [thread:$0]  %s157_s20, 16, %s520_s3, [#allocation5]  }
  0x54   :  { %s407_s7 = smov [#allocation9]   ;;  %s408_s9 = smov [#allocation11]  }
  0x55   :  { %s166_s8 = sshll.u32 %s407_s7, 4  ;;  %s176_s10 = sshll.u32 %s408_s9, 4  ;;  %s167_s8 = int_to_ptr.vmem [resolvable:$true] %s166_s8  ;;  %s485_s10 = int_to_ptr.vmem [resolvable:$true] %s176_s10 }
  0x56   :  { %s347_s11 = scalar_lea.vmem %s167_s8, 16  ;;  %s351_s12 = scalar_lea.vmem %s167_s8, 32 }
  0x57   :  { %p348_p10 = scmp.ne.s32.totalorder %s167_s8, %s347_s11  ;;  %p352_p11 = scmp.lt.s32.totalorder %s167_s8, %s167_s8 }
  0x58   :  { %p353_p12 = scmp.lt.s32.totalorder %s351_s12, %s347_s11 }
  0x5a   :  { %p354_p13 = por %p353_p12, %p352_p11 }
  0x5c   :  { %p355_p0 = pnand %p354_p13, %p348_p10 }
 0x11e   :  { %v144_v35 = vpop.f32.mrb[0].mxu0 }
 0x11f   :  { %148 = vst [vmem:[#allocation2] sm:$0x1] %v144_v35  ;;  %149 = vst [vmem:[#allocation9] sm:$0x1] %v144_v35  ;;  %v244_v36 = vpop.f32.mrb[1].mxu0 }
 0x120   :  { %358 = shalt.err (!%p355_p0)
}
 0x121   :  { %s359_s14 = scalar_lea.hbm %s521_s4, 16 }
 0x122   :  { %p360_p1 = scmp.ne.s32.totalorder %s521_s4, %s359_s14  ;;  %p363_p2 = scmp.lt.u32.totalorder %s359_s14, %s521_s4 }
 0x124   :  { %p365_p3 = pnand %p363_p2, %p360_p1 }
 0x126   :  { %368 = shalt.err (!%p365_p3)
}
 0x127   :  { %169 = dma.vmem_to_hbm [thread:$0]  %s167_s8, 16, %s521_s4, [#allocation10]  }
 0x128   :  { %s369_s19 = scalar_lea.vmem %s485_s10, 16  ;;  %s373_s1 = scalar_lea.vmem %s485_s10, 32 }
 0x129   :  { %p370_p4 = scmp.ne.s32.totalorder %s485_s10, %s369_s19  ;;  %p374_p5 = scmp.lt.s32.totalorder %s485_s10, %s485_s10 }
 0x12a   :  { %p375_p6 = scmp.lt.s32.totalorder %s373_s1, %s369_s19 }
 0x12c   :  { %p376_p7 = por %p375_p6, %p374_p5 }
 0x12e   :  { %p377_p8 = pnand %p376_p7, %p370_p4 }
 0x130   :  { %380 = shalt.err (!%p377_p8)
}
 0x131   :  { %s381_s22 = scalar_lea.hbm %s522_s5, 16 }
 0x132   :  { %p382_p9 = scmp.ne.s32.totalorder %s522_s5, %s381_s22  ;;  %p385_p10 = scmp.lt.u32.totalorder %s381_s22, %s522_s5 }
 0x134   :  { %p387_p11 = pnand %p385_p10, %p382_p9 }
 0x136   :  { %390 = shalt.err (!%p387_p11)
}
 0x137   :  { %179 = dma.vmem_to_hbm [thread:$0]  %s485_s10, 16, %s522_s5, [#allocation10]  }
 0x138   :  { %395 = dma.done.wait [#allocation5], 16  }
 0x139   :  { %396 = vsyncadd [#allocation5], 4294967280 }
 0x13a   :  { %397 = dma.done.wait [#allocation10], 32  }
 0x13b   :  { %398 = vsyncadd [#allocation10], 4294967264 }
 0x13c   :  { %189 = vsyncpa [#allocation4], 1 }
 0x13d   :  { %190 = vsyncpa [#allocation7], 1 }
 0x13e   :  { %191 = vsyncpa [#allocation5], 1 }
 0x13f   :  { %192 = vsyncpa [#allocation10], 1 }

</bundles_post_ra>
